<compile_context>
chip_gen: v6e
topology: v6e:2x2x1
jax: 0.10.0
libtpu: 0.0.40
codegen_flags: <defaults>
</compile_context>

<pallas_src>
import functools

import jax
import jax.numpy as jnp
from jax.experimental import pallas as pl
from jax.experimental.pallas import tpu as pltpu

BN_EPS = 1e-5
NEG_SLOPE = 0.2
VMEM_LIMIT_BYTES = 48 * 1024 * 1024   # fits v7x's 64 MiB physical VMEM; raise on v5e/v6e


# --------------------------------------------------------------------------------------
# pltpu.roll direction probe (cached).  The Mosaic rotate convention is expected to match
# jnp.roll, but we probe once with a trivial kernel so the conv windowing is robust across
# jax versions; both conventions are handled in _shift_reflect.  (Runs eagerly, un-jitted.)
# --------------------------------------------------------------------------------------
_ROLL_IS_JNP_LIKE = None


def _roll_probe_kernel(x_ref, o_ref):
    o_ref[...] = pltpu.roll(x_ref[...], shift=1, axis=1)


def _roll_is_jnp_like():
    global _ROLL_IS_JNP_LIKE
    if _ROLL_IS_JNP_LIKE is None:
        x = jnp.tile(jnp.arange(128, dtype=jnp.float32), (8, 1))
        y = pl.pallas_call(
            _roll_probe_kernel,
            out_shape=jax.ShapeDtypeStruct((8, 128), jnp.float32),
        )(x)
        # jnp.roll(x, 1, axis=1) puts value 127 at lane 0.
        _ROLL_IS_JNP_LIKE = bool(y[0, 0] == 127.0)
    return _ROLL_IS_JNP_LIKE


# --------------------------------------------------------------------------------------
# In-kernel helpers
# --------------------------------------------------------------------------------------
def _shift_reflect(x, s, lane, roll_is_jnp):
    """(C, T) slab shifted by s lanes with ReflectionPad1d boundary handling.

    Returns y with y[:, t] = x[:, reflect(t + s)].  One XLU roll + |s| iota-masked
    fixes of the reflected boundary lanes; no padded slab is materialized.
    """
    if s == 0:
        return x
    T = x.shape[1]
    shift = (-s) % T if roll_is_jnp else s % T
    y = pltpu.roll(x, shift=shift, axis=1)
    if s < 0:
        for t in range(-s):                       # lanes 0..-s-1 reflect off the head
            j = -s - t                            # needed column x[:, -(t+s)]
            y = jnp.where(lane == t, x[:, j:j + 1], y)
    else:
        for u in range(s):                        # lanes T-s..T-1 reflect off the tail
            j = T - 2 - u                         # needed column x[:, 2(T-1)-(t+s)]
            y = jnp.where(lane == T - s + u, x[:, j:j + 1], y)
    return y


def _conv1_taps(x, w1_ref, lane, *, ks, dilation, pad, roll_is_jnp, mxu_dtype):
    """k-tap dilated Conv1d (no bias) on one (C, T) slab, reflection-padded in-register.

    ks accumulating (C, C) @ (C, T) MXU matmuls with f32 accumulation (the MRB
    accumulates in place on v7x); matches PyTorch Conv1d cross-correlation semantics.
    """
    acc = None
    for k in range(ks):
        s = k * dilation - pad
        xs = _shift_reflect(x, s, lane, roll_is_jnp)
        p = jnp.dot(w1_ref[k], xs.astype(mxu_dtype),
                    preferred_element_type=jnp.float32)
        acc = p if acc is None else acc + p
    return acc                                    # (C, T) f32


# --------------------------------------------------------------------------------------
# Phase 1: per-item conv1 moments (sum, centered M2) -> combined outside the kernel.
# --------------------------------------------------------------------------------------
def _stats_kernel(x_ref, w1_ref, stats_ref, *, nb, ks, dilation, pad,
                  roll_is_jnp, mxu_dtype, inv_t):
    C, T = x_ref.shape[1], x_ref.shape[2]
    lane = jax.lax.broadcasted_iota(jnp.int32, (C, T), 1)     # hoisted out of the loops
    for i in range(nb):                                        # nb static, unrolled
        y = _conv1_taps(x_ref[i], w1_ref, lane, ks=ks, dilation=dilation, pad=pad,
                        roll_is_jnp=roll_is_jnp, mxu_dtype=mxu_dtype)
        s = jnp.sum(y, axis=1, keepdims=True)                  # (C, 1) item sum
        d = y - s * inv_t                                      # centered around item mean
        m2 = jnp.sum(d * d, axis=1, keepdims=True)             # (C, 1) item M2
        stats_ref[i] = jnp.concatenate([s, m2], axis=1)        # (C, 2)


# --------------------------------------------------------------------------------------
# Phase 2: recompute conv1, apply folded BN + LeakyReLU + 1x1 conv + residual.
# --------------------------------------------------------------------------------------
def _apply_kernel(x_ref, w1_ref, w2_ref, b2_ref, scale_ref, shift_ref, o_ref,
                  *, nb, ks, dilation, pad, roll_is_jnp, mxu_dtype):
    C, T = x_ref.shape[1], x_ref.shape[2]
    lane = jax.lax.broadcasted_iota(jnp.int32, (C, T), 1)
    scale = scale_ref[...]                                     # (C, 1) f32
    shift = shift_ref[...]                                     # (C, 1) f32
    b2 = b2_ref[...]                                           # (C, 1) f32
    for i in range(nb):                                        # nb static, unrolled
        x = x_ref[i]                                           # (C, T) f32
        y = _conv1_taps(x, w1_ref, lane, ks=ks, dilation=dilation, pad=pad,
                        roll_is_jnp=roll_is_jnp, mxu_dtype=mxu_dtype)
        y = y * scale + shift                                  # folded BatchNorm1d
        y = jnp.where(y > 0, y, NEG_SLOPE * y)                 # LeakyReLU(0.2)
        z = jnp.dot(w2_ref[...], y.astype(mxu_dtype),
                    preferred_element_type=jnp.float32) + b2   # Conv1d 1x1 + bias
        o_ref[i] = (x + z).astype(o_ref.dtype)                 # residual add


# --------------------------------------------------------------------------------------
# Wrapper
# --------------------------------------------------------------------------------------
def _pick_batch_group(n, batch_group):
    nb = 1
    for d in range(1, min(batch_group, n) + 1):
        if n % d == 0:
            nb = d
    return nb


def resblock_forward(x, w1, w2, b2, gamma, beta, dilation=1,
                     mxu_dtype=jnp.bfloat16, batch_group=8):
    """x: (N, C, T) float32 (PyTorch NCL layout).  Returns (N, C, T)."""
    N, C, T = x.shape
    ks = w1.shape[-1]
    assert ks % 2 == 1, "even ks changes output length under ReflectionPad1d + Conv1d"
    pad = (ks // 2) * dilation
    assert pad <= T - 1, "reflection padding requires pad <= T - 1"

    nb = _pick_batch_group(N, batch_group)        # batch items per grid step
    grid = (N // nb,)
    roll_is_jnp = _roll_is_jnp_like()

    # One-time parameter relayouts / casts (O(ks*C^2)); weights live in VMEM per step.
    w1t = jnp.transpose(w1, (2, 0, 1)).astype(mxu_dtype)       # (ks, Cout, Cin)
    w2f = w2.reshape(C, C).astype(mxu_dtype)
    b2c = b2.reshape(C, 1).astype(jnp.float32)

    x_spec = pl.BlockSpec((nb, C, T), lambda n: (n, 0, 0))

    def full(shape):
        return pl.BlockSpec(shape, lambda n: (0,) * len(shape))

    cp = pltpu.CompilerParams(dimension_semantics=("parallel",),
                              vmem_limit_bytes=VMEM_LIMIT_BYTES)

    # ---- Phase 1: per-item moments, fully parallel over grid blocks -------------------
    part = pl.pallas_call(
        functools.partial(_stats_kernel, nb=nb, ks=ks, dilation=dilation, pad=pad,
                          roll_is_jnp=roll_is_jnp, mxu_dtype=mxu_dtype,
                          inv_t=1.0 / float(T)),
        grid=grid,
        in_specs=[x_spec, full((ks, C, C))],
        out_specs=pl.BlockSpec((nb, C, 2), lambda n: (n, 0, 0)),
        out_shape=jax.ShapeDtypeStruct((N, C, 2), jnp.float32),
        compiler_params=cp,
    )(x, w1t)

    # Chan parallel-variance combine of per-item moments -> global mean / biased var,
    # then fold BatchNorm into per-channel scale/shift (tiny (C,)-sized JAX ops).
    sums, m2s = part[:, :, 0], part[:, :, 1]                   # (N, C) each
    count = float(N * T)
    mean = jnp.sum(sums, axis=0) / count                       # (C,)
    item_mean = sums / float(T)                                # (N, C)
    m2 = jnp.sum(m2s, axis=0) + float(T) * jnp.sum(
        jnp.square(item_mean - mean[None, :]), axis=0)
    var = m2 / count                                           # biased variance
    scale = (gamma * jax.lax.rsqrt(var + BN_EPS)).astype(jnp.float32)
    shift = (beta - mean * scale).astype(jnp.float32)

    # ---- Phase 2: re-stream x, apply BN + LeakyReLU + conv2 + residual ----------------
    out = pl.pallas_call(
        functools.partial(_apply_kernel, nb=nb, ks=ks, dilation=dilation, pad=pad,
                          roll_is_jnp=roll_is_jnp, mxu_dtype=mxu_dtype),
        grid=grid,
        in_specs=[x_spec, full((ks, C, C)), full((C, C)),
                  full((C, 1)), full((C, 1)), full((C, 1))],
        out_specs=x_spec,
        out_shape=jax.ShapeDtypeStruct((N, C, T), x.dtype),
        compiler_params=cp,
    )(x, w1t, w2f, b2c, scale.reshape(C, 1), shift.reshape(C, 1))
    return out


# --------------------------------------------------------------------------------------
# Pure-JAX reference (same math as the PyTorch module in training mode)
# --------------------------------------------------------------------------------------
def resblock_reference(x, w1, w2, b2, gamma, beta, dilation=1):
    N, C, T = x.shape
    ks = w1.shape[-1]
    pad = (ks // 2) * dilation
    xp = jnp.pad(x, ((0, 0), (0, 0), (pad, pad)), mode="reflect")
    y = jnp.zeros((N, C, T), jnp.float32)
    for k in range(ks):
        y = y + jnp.einsum("oi,nit->not", w1[:, :, k],
                           xp[:, :, k * dilation: k * dilation + T])
    mean = jnp.mean(y, axis=(0, 2), keepdims=True)
    var = jnp.mean((y - mean) ** 2, axis=(0, 2), keepdims=True)
    y = gamma[None, :, None] * (y - mean) * jax.lax.rsqrt(var + BN_EPS) + beta[None, :, None]
    y = jnp.where(y > 0, y, NEG_SLOPE * y)
    z = jnp.einsum("oi,nit->not", w2.reshape(C, C), y) + b2[None, :, None]
    return x + z


if __name__ == "__main__":
    # Small shapes consistent with the module: dim = C channels, ks = 3, dilation = 1.
    # C is a multiple of 8 sublanes, T a multiple of 128 lanes (lane-dense stores).
    N, C, T = 4, 16, 256
    KS, DIL = 3, 1

    key = jax.random.PRNGKey(0)
    kx, kw1, kw2, kb2, kg, kb = jax.random.split(key, 6)

    x = jax.random.normal(kx, (N, C, T), dtype=jnp.float32)
    # Deterministic synthetic parameters (shapes from nn.Conv1d / nn.BatchNorm1d).
    w1 = 0.1 * jax.random.normal(kw1, (C, C, KS), dtype=jnp.float32)    # conv1 weight
    w2 = 0.1 * jax.random.normal(kw2, (C, C, 1), dtype=jnp.float32)     # conv2 (1x1) weight
    b2 = 0.1 * jax.random.normal(kb2, (C,), dtype=jnp.float32)          # conv2 bias
    gamma = 1.0 + 0.1 * jax.random.normal(kg, (C,), dtype=jnp.float32)  # BN weight
    beta = 0.1 * jax.random.normal(kb, (C,), dtype=jnp.float32)         # BN bias

    ref = resblock_reference(x, w1, w2, b2, gamma, beta, dilation=DIL)

    # f32 MXU-operand path (bit-faithful), batch_group=2 -> grid of 2 blocks of 2 items.
    out_f32 = jax.block_until_ready(
        resblock_forward(x, w1, w2, b2, gamma, beta, dilation=DIL,
                         mxu_dtype=jnp.float32, batch_group=2))
    assert out_f32.shape == x.shape
    assert jnp.allclose(out_f32, ref, atol=2e-3, rtol=2e-3), "f32 path mismatch vs reference"

    # Default bf16 MXU-operand path (v6e/v7x fast path); looser tolerance.
    out_bf16 = jax.block_until_ready(
        resblock_forward(x, w1, w2, b2, gamma, beta, dilation=DIL, batch_group=2))
    assert out_bf16.shape == x.shape
    assert jnp.allclose(out_bf16, ref, atol=5e-2, rtol=5e-2), "bf16 path mismatch vs reference"

    print("KERNEL_OK")
</pallas_src>

<mosaic_0001>
module attributes {stable_mosaic.version = 11 : i64} {
  func.func @_roll_probe_kernel(%arg0: memref<8x128xf32, #tpu.memory_space<vmem>>, %arg1: memref<8x128xf32, #tpu.memory_space<vmem>>) attributes {dimension_semantics = [], scalar_prefetch = 0 : i64, scratch_operands = 0 : i64, tpu.core_type = #tpu.core_type<tc>} {
    %c0 = arith.constant 0 : index
    %c0_0 = arith.constant 0 : index
    %0 = vector.load %arg0[%c0, %c0_0] : memref<8x128xf32, #tpu.memory_space<vmem>>, vector<8x128xf32>
    %c1_i32 = arith.constant 1 : i32
    %1 = tpu.dynamic_rotate %0 by %c1_i32 dim 1 : vector<8x128xf32>, i32 -> vector<8x128xf32>
    %c0_1 = arith.constant 0 : index
    %c0_2 = arith.constant 0 : index
    %2 = vector.load %arg1[%c0_1, %c0_2] : memref<8x128xf32, #tpu.memory_space<vmem>>, vector<8x128xf32>
    tpu.vector_store %arg1[%c0_1, %c0_2], %1 {strides = array<i32>} : memref<8x128xf32, #tpu.memory_space<vmem>>, vector<8x128xf32>,
    return
  }
}

</mosaic_0001>

<bundles_post_ra>
// kernel: tpu_custom_call.1
= control target key start
LH: loop header
LB: loop body
LE: loop exit
PB: predicated region body
PF: predicated region fallthrough
CT: control target
= control target key end

     0   :  { %6 = vsyncpa [#allocation3], 0  ;;  %s106_s0 = inlined_call_operand.hbm [shape: f32[8,128], index: 0, kind: input, shape index: {}]   ;;  %s107_s1 = inlined_call_operand.hbm [shape: f32[8,128], index: 1, kind: output, shape index: {}]  }
   0x1   :  { %7 = vsyncpa [#allocation4], 0  ;;  %s87_s6 = smov [#allocation2]  }
   0x2   :  { %s14_s7 = sshll.u32 %s87_s6, 4  ;;  %s15_s7 = int_to_ptr.vmem [resolvable:$true] %s14_s7 }
   0x3   :  { %s51_s8 = scalar_lea.vmem %s15_s7, 128  ;;  %p56_p1 = scmp.lt.s32.totalorder %s15_s7, %s15_s7 }
   0x4   :  { %p52_p0 = scmp.ne.s32.totalorder %s15_s7, %s51_s8  ;;  %p57_p2 = scmp.lt.s32.totalorder %s51_s8, %s51_s8 }
   0x6   :  { %p58_p3 = por %p57_p2, %p56_p1 }
   0x8   :  { %p59_p4 = pnand %p58_p3, %p52_p0 }
   0xa   :  { %62 = shalt.err (!%p59_p4)
}
   0xb   :  { %17 = dma.hbm_to_vmem [thread:$0]  %s106_s0, 128, %s15_s7, [#allocation3]  }
   0xc   :  { %83 = dma.done.wait [#allocation3], 128  }
   0xd   :  { %84 = vsyncadd [#allocation3], 4294967168  ;;  %v21_v0 = vld [vmem:[#allocation2] sm:$0xff]  ;;  %s88_s11 = smov 1   ;;  %s89_s12 = smov [#allocation5]  }
   0xe   :  { %22 = vrot.lane.b32.xlu0 %v21_v0, %s88_s11  ;;  %s31_s13 = sshll.u32 %s89_s12, 4  ;;  %s32_s13 = int_to_ptr.vmem [resolvable:$true] %s31_s13 }
   0xf   :  { %s63_s14 = scalar_lea.vmem %s32_s13, 128  ;;  %p68_p6 = scmp.lt.s32.totalorder %s32_s13, %s32_s13 }
  0x10   :  { %p64_p5 = scmp.ne.s32.totalorder %s32_s13, %s63_s14  ;;  %p69_p7 = scmp.lt.s32.totalorder %s63_s14, %s63_s14 }
  0x12   :  { %p70_p8 = por %p69_p7, %p68_p6 }
  0x14   :  { %p71_p9 = pnand %p70_p8, %p64_p5 }
  0x80   :  { %v23_v1 = vpop.permute.xlu0 %22 }
  0x81   :  { %24 = vst [vmem:[#allocation5] sm:$0xff] %v23_v1 }
  0x82   :  { %74 = shalt.err (!%p71_p9)
}
  0x83   :  { %34 = dma.vmem_to_hbm [thread:$0]  %s32_s13, 128, %s107_s1, [#allocation4]  }
  0x84   :  { %85 = dma.done.wait [#allocation4], 128  }
  0x85   :  { %86 = vsyncadd [#allocation4], 4294967168 }
  0x86   :  { %38 = vsyncpa [#allocation3], 1 }
  0x87   :  { %39 = vsyncpa [#allocation4], 1 }

</bundles_post_ra>
